<compile_context>
chip_gen: v6e
topology: v6e:2x2x1
jax: 0.10.0
libtpu: 0.0.40
codegen_flags: <defaults>
</compile_context>

<pallas_src>
import functools

import jax
import jax.numpy as jnp
from jax.experimental import pallas as pl
from jax.experimental.pallas import tpu as pltpu


def _round_up(x, m):
    return ((x + m - 1) // m) * m


def _choose_batch_tile(B):
    """Batch tile: 8-aligned, MXU-filling when possible, >=2 grid steps for
    megacore when the batch is big enough."""
    b8 = _round_up(B, 8)
    if b8 >= 512:
        return 256                      # fills 256x256 MXU, >=2 grid steps
    if b8 > 256:
        return 128                      # keep >=2 grid steps (v7x megacore)
    if b8 >= 16:
        return _round_up(b8, 16) // 2   # split into 2 x 8-aligned tiles
    return b8                           # tiny batch: one 8-row tile


def _vmem_limit_bytes(tb, in_pad, h_pad, out_pad, n_layers):
    """Scoped-VMEM request: resident weights + double-buffered tiles +
    f32 intermediates, with headroom. Floor = 32 MiB default, cap = v7x 64 MiB."""
    w_bytes = 2 * (in_pad * h_pad + n_layers * h_pad * h_pad + h_pad * out_pad)
    b_bytes = 4 * (h_pad + n_layers * h_pad + out_pad)
    x_bytes = 4 * tb * in_pad
    o_bytes = 4 * tb * out_pad
    interm = 4 * tb * h_pad * 3
    total = 2 * (w_bytes + b_bytes + x_bytes + o_bytes) + interm  # 2x: dbl-buf
    total = int(total * 1.5) + (1 << 20)
    return min(max(total, 32 * 1024 * 1024), 64 * 1024 * 1024)


def mlp_kernel(x_ref, w_in_ref, b_in_ref, w_h_ref, b_h_ref,
               w_out_ref, b_out_ref, o_ref, *, n_layers):
    # bf16 cast of the activation tile happens in-kernel (VPU, hidden under
    # MXU work) instead of a wrapper-side HBM round trip.
    x = x_ref[...].astype(jnp.bfloat16)

    # Input layer: bf16 MXU matmul with f32 accumulation, bias + ReLU in f32.
    h = jnp.dot(x, w_in_ref[...], preferred_element_type=jnp.float32)
    h = jnp.maximum(h + b_in_ref[...], 0.0)

    # Hidden stack, statically unrolled (n_layers is tiny here). For deep
    # stacks, switch to lax.fori_loop with dynamic w_h_ref[l] indexing to
    # bound vreg live ranges.
    for l in range(n_layers):
        h = jnp.dot(h.astype(jnp.bfloat16), w_h_ref[l],
                    preferred_element_type=jnp.float32)
        h = jnp.maximum(h + b_h_ref[pl.ds(l, 1), :], 0.0)

    # Output layer (no activation). Padded b_out lanes are pre-set to -1e30
    # (and padded w_out columns are zero), so no in-kernel lane mask is
    # needed before the log-softmax reduction.
    logits = jnp.dot(h.astype(jnp.bfloat16), w_out_ref[...],
                     preferred_element_type=jnp.float32) + b_out_ref[...]

    # Numerically-stable log_softmax over dim=1.
    m = jnp.max(logits, axis=-1, keepdims=True)
    shifted = logits - m
    lse = jnp.log(jnp.sum(jnp.exp(shifted), axis=-1, keepdims=True))
    o_ref[...] = (shifted - lse).astype(o_ref.dtype)


def prepare_kernel_params(params, *, n_layers):
    """Run ONCE at init: pad logical params to (8,128)-friendly shapes,
    weights -> bf16, and bake the output-lane mask into b_out."""
    w_in, b_in, w_h, b_h, w_out, b_out = params
    in_w, hid = w_in.shape
    out_w = w_out.shape[1]
    in_pad = _round_up(in_w, 128)
    h_pad = _round_up(hid, 128)
    out_pad = _round_up(out_w, 128)

    w_in_p = jnp.zeros((in_pad, h_pad), jnp.float32).at[:in_w, :hid].set(w_in)
    b_in_p = jnp.zeros((1, h_pad), jnp.float32).at[:, :hid].set(b_in)
    w_h_p = jnp.zeros((n_layers, h_pad, h_pad), jnp.float32)
    w_h_p = w_h_p.at[:, :hid, :hid].set(w_h)
    b_h_p = jnp.zeros((n_layers, h_pad), jnp.float32).at[:, :hid].set(b_h)
    w_out_p = jnp.zeros((h_pad, out_pad), jnp.float32).at[:hid, :out_w].set(w_out)
    # Padded logit lanes get a -1e30 bias: since the corresponding w_out
    # columns are zero and h >= 0, this reproduces the lane mask exactly.
    b_out_p = jnp.full((1, out_pad), -1e30, jnp.float32).at[:, :out_w].set(b_out)

    return (w_in_p.astype(jnp.bfloat16), b_in_p,
            w_h_p.astype(jnp.bfloat16), b_h_p,
            w_out_p.astype(jnp.bfloat16), b_out_p)


def net_forward(x_nchw, prepared_params, *, n_layers, out_width):
    """x_nchw: (B, C, H, W) float32. prepared_params: output of
    prepare_kernel_params. Returns (B, out_width) log-probs (f32)."""
    w_in, b_in, w_h, b_h, w_out, b_out = prepared_params
    in_pad, h_pad = w_in.shape
    out_pad = w_out.shape[1]

    B = x_nchw.shape[0]
    x_flat = x_nchw.reshape(B, -1)            # same as nn.Flatten on NCHW
    in_w = x_flat.shape[1]

    tb = _choose_batch_tile(B)
    b_pad = _round_up(B, tb)
    if b_pad > B or in_pad > in_w:
        x_flat = jnp.pad(x_flat, ((0, b_pad - B), (0, in_pad - in_w)))

    flops = 2 * b_pad * (in_pad * h_pad + n_layers * h_pad * h_pad
                         + h_pad * out_pad)
    bytes_accessed = (4 * b_pad * in_pad + 4 * b_pad * out_pad
                      + 2 * (in_pad * h_pad + n_layers * h_pad * h_pad
                             + h_pad * out_pad)
                      + 4 * ((n_layers + 1) * h_pad + out_pad))
    cost = pl.CostEstimate(flops=flops, bytes_accessed=bytes_accessed,
                           transcendentals=b_pad * out_pad)

    kernel = functools.partial(mlp_kernel, n_layers=n_layers)
    out_padded = pl.pallas_call(
        kernel,
        out_shape=jax.ShapeDtypeStruct((b_pad, out_pad), jnp.float32),
        grid_spec=pltpu.PrefetchScalarGridSpec(
            num_scalar_prefetch=0,
            grid=(b_pad // tb,),
            in_specs=[
                pl.BlockSpec((tb, in_pad), lambda i: (i, 0)),            # x tile (f32)
                pl.BlockSpec((in_pad, h_pad), lambda i: (0, 0)),         # w_in
                pl.BlockSpec((1, h_pad), lambda i: (0, 0)),              # b_in
                pl.BlockSpec((n_layers, h_pad, h_pad), lambda i: (0, 0, 0)),  # w_h
                pl.BlockSpec((n_layers, h_pad), lambda i: (0, 0)),       # b_h
                pl.BlockSpec((h_pad, out_pad), lambda i: (0, 0)),        # w_out
                pl.BlockSpec((1, out_pad), lambda i: (0, 0)),            # b_out
            ],
            out_specs=pl.BlockSpec((tb, out_pad), lambda i: (i, 0)),
        ),
        compiler_params=pltpu.CompilerParams(
            dimension_semantics=("parallel",),
            vmem_limit_bytes=_vmem_limit_bytes(tb, in_pad, h_pad, out_pad,
                                               n_layers)),
        cost_estimate=cost,
    )(x_flat, w_in, b_in, w_h, b_h, w_out, b_out)

    # Slice away batch / lane padding (padded lanes hold ~-1e30, never use
    # out_padded directly).
    return out_padded[:B, :out_width]


def init_params(key, input_width, hidden_width, output_width, n_layers):
    """Deterministic synthetic params. Weights stored as (in, out); biases (1/_, out)."""
    ks = jax.random.split(key, 6)
    w_in = jax.random.normal(ks[0], (input_width, hidden_width), jnp.float32) * 0.05
    b_in = jax.random.normal(ks[1], (1, hidden_width), jnp.float32) * 0.05
    w_h = jax.random.normal(ks[2], (n_layers, hidden_width, hidden_width),
                            jnp.float32) * 0.05
    b_h = jax.random.normal(ks[3], (n_layers, hidden_width), jnp.float32) * 0.05
    w_out = jax.random.normal(ks[4], (hidden_width, output_width), jnp.float32) * 0.05
    b_out = jax.random.normal(ks[5], (1, output_width), jnp.float32) * 0.05
    return (w_in, b_in, w_h, b_h, w_out, b_out)


def reference_forward(x_nchw, params, *, n_layers):
    """Pure-JAX reference (mirrors the PyTorch forward), using bf16-rounded
    weights/activations so it tracks the kernel's MXU numerics."""
    w_in, b_in, w_h, b_h, w_out, b_out = params
    bf = lambda a: a.astype(jnp.bfloat16).astype(jnp.float32)
    h = x_nchw.reshape(x_nchw.shape[0], -1)
    h = jnp.maximum(bf(h) @ bf(w_in) + b_in, 0.0)
    for l in range(n_layers):
        h = jnp.maximum(bf(h) @ bf(w_h[l]) + b_h[l][None, :], 0.0)
    logits = bf(h) @ bf(w_out) + b_out
    return jax.nn.log_softmax(logits, axis=1)


if __name__ == "__main__":
    # Small shapes consistent with the module: Net(n_layers=2, hidden_width=32,
    # input_width=4*16*16, output_width=10) applied to an NCHW image batch.
    B, C, H, W = 2, 4, 16, 16
    n_layers = 2
    hidden_width = 32
    input_width = C * H * W
    output_width = 10

    key = jax.random.PRNGKey(0)
    k_x, k_p = jax.random.split(key)
    x = jax.random.normal(k_x, (B, C, H, W), jnp.float32)
    params = init_params(k_p, input_width, hidden_width, output_width, n_layers)

    # Pad + bf16-cast the weight stack ONCE at init (hoisted out of forward).
    prepared = prepare_kernel_params(params, n_layers=n_layers)
    prepared = jax.block_until_ready(prepared)

    forward = jax.jit(functools.partial(net_forward, n_layers=n_layers,
                                        out_width=output_width))
    out = forward(x, prepared)
    out = jax.block_until_ready(out)

    ref = reference_forward(x, params, n_layers=n_layers)
    assert out.shape == (B, output_width)
    assert jnp.allclose(out, ref, atol=2e-2, rtol=2e-2), (
        float(jnp.max(jnp.abs(out - ref))))

    print("KERNEL_OK")
</pallas_src>

<mosaic_0001>
module attributes {stable_mosaic.version = 11 : i64} {
  func.func @mlp_kernel(%arg0: i32, %arg1: memref<8x1024xf32, #tpu.memory_space<vmem>>, %arg2: memref<1024x128xbf16, #tpu.memory_space<vmem>>, %arg3: memref<1x128xf32, #tpu.memory_space<vmem>>, %arg4: memref<2x128x128xbf16, #tpu.memory_space<vmem>>, %arg5: memref<2x128xf32, #tpu.memory_space<vmem>>, %arg6: memref<128x128xbf16, #tpu.memory_space<vmem>>, %arg7: memref<1x128xf32, #tpu.memory_space<vmem>>, %arg8: memref<8x128xf32, #tpu.memory_space<vmem>>) attributes {dimension_semantics = [#tpu.dimension_semantics<parallel>], iteration_bounds = array<i64: 1>, scalar_prefetch = 0 : i64, scratch_operands = 0 : i64, tpu.core_type = #tpu.core_type<tc>, window_params = [{transform_indices = @transform_0, window_bounds = array<i64: 8, 1024>}, {pipeline_mode = #tpu.pipeline_mode<synchronous>, transform_indices = @transform_1, window_bounds = array<i64: 1024, 128>}, {pipeline_mode = #tpu.pipeline_mode<synchronous>, transform_indices = @transform_2, window_bounds = array<i64: 1, 128>}, {pipeline_mode = #tpu.pipeline_mode<synchronous>, transform_indices = @transform_3, window_bounds = array<i64: 2, 128, 128>}, {pipeline_mode = #tpu.pipeline_mode<synchronous>, transform_indices = @transform_4, window_bounds = array<i64: 2, 128>}, {pipeline_mode = #tpu.pipeline_mode<synchronous>, transform_indices = @transform_5, window_bounds = array<i64: 128, 128>}, {pipeline_mode = #tpu.pipeline_mode<synchronous>, transform_indices = @transform_6, window_bounds = array<i64: 1, 128>}, {transform_indices = @transform_7, window_bounds = array<i64: 8, 128>}]} {
    %c0 = arith.constant 0 : index
    %c0_0 = arith.constant 0 : index
    %0 = vector.load %arg1[%c0, %c0_0] : memref<8x1024xf32, #tpu.memory_space<vmem>>, vector<8x1024xf32>
    %1 = arith.truncf %0 : vector<8x1024xf32> to vector<8x1024xbf16>
    %c0_1 = arith.constant 0 : index
    %c0_2 = arith.constant 0 : index
    %2 = vector.load %arg2[%c0_1, %c0_2] : memref<1024x128xbf16, #tpu.memory_space<vmem>>, vector<1024x128xbf16>
    %cst = arith.constant dense<0.000000e+00> : vector<8x128xf32>
    %3 = tpu.matmul %1, %2, %cst {dimension_numbers = #tpu.dot_dimension_numbers<[1], [0], [0], [1], [0, 0, 1, 1], [], []>} : vector<8x1024xbf16>, vector<1024x128xbf16>, vector<8x128xf32> -> vector<8x128xf32>
    %c0_3 = arith.constant 0 : index
    %c0_4 = arith.constant 0 : index
    %4 = vector.load %arg3[%c0_3, %c0_4] : memref<1x128xf32, #tpu.memory_space<vmem>>, vector<1x128xf32>
    %5 = vector.broadcast %4 : vector<1x128xf32> to vector<8x128xf32>
    %6 = arith.addf %3, %5 : vector<8x128xf32>
    %cst_5 = arith.constant 0.000000e+00 : f32
    %7 = vector.broadcast %cst_5 : f32 to vector<8x128xf32>
    %8 = arith.maximumf %6, %7 : vector<8x128xf32>
    %9 = arith.truncf %8 : vector<8x128xf32> to vector<8x128xbf16>
    %c0_6 = arith.constant 0 : index
    %c0_7 = arith.constant 0 : index
    %c0_8 = arith.constant 0 : index
    %10 = vector.load %arg4[%c0_6, %c0_7, %c0_8] : memref<2x128x128xbf16, #tpu.memory_space<vmem>>, vector<1x128x128xbf16>
    %11 = vector.shape_cast %10 : vector<1x128x128xbf16> to vector<128x128xbf16>
    %cst_9 = arith.constant dense<0.000000e+00> : vector<8x128xf32>
    %12 = tpu.matmul %9, %11, %cst_9 {dimension_numbers = #tpu.dot_dimension_numbers<[1], [0], [0], [1], [0, 0, 1, 1], [], []>} : vector<8x128xbf16>, vector<128x128xbf16>, vector<8x128xf32> -> vector<8x128xf32>
    %c0_10 = arith.constant 0 : index
    %c0_11 = arith.constant 0 : index
    %13 = vector.load %arg5[%c0_10, %c0_11] : memref<2x128xf32, #tpu.memory_space<vmem>>, vector<1x128xf32>
    %14 = vector.broadcast %13 : vector<1x128xf32> to vector<8x128xf32>
    %15 = arith.addf %12, %14 : vector<8x128xf32>
    %cst_12 = arith.constant 0.000000e+00 : f32
    %16 = vector.broadcast %cst_12 : f32 to vector<8x128xf32>
    %17 = arith.maximumf %15, %16 : vector<8x128xf32>
    %18 = arith.truncf %17 : vector<8x128xf32> to vector<8x128xbf16>
    %c1 = arith.constant 1 : index
    %c0_13 = arith.constant 0 : index
    %c0_14 = arith.constant 0 : index
    %19 = vector.load %arg4[%c1, %c0_13, %c0_14] : memref<2x128x128xbf16, #tpu.memory_space<vmem>>, vector<1x128x128xbf16>
    %20 = vector.shape_cast %19 : vector<1x128x128xbf16> to vector<128x128xbf16>
    %cst_15 = arith.constant dense<0.000000e+00> : vector<8x128xf32>
    %21 = tpu.matmul %18, %20, %cst_15 {dimension_numbers = #tpu.dot_dimension_numbers<[1], [0], [0], [1], [0, 0, 1, 1], [], []>} : vector<8x128xbf16>, vector<128x128xbf16>, vector<8x128xf32> -> vector<8x128xf32>
    %c1_16 = arith.constant 1 : index
    %c0_17 = arith.constant 0 : index
    %22 = vector.load %arg5[%c1_16, %c0_17] : memref<2x128xf32, #tpu.memory_space<vmem>>, vector<1x128xf32>
    %23 = vector.broadcast %22 : vector<1x128xf32> to vector<8x128xf32>
    %24 = arith.addf %21, %23 : vector<8x128xf32>
    %cst_18 = arith.constant 0.000000e+00 : f32
    %25 = vector.broadcast %cst_18 : f32 to vector<8x128xf32>
    %26 = arith.maximumf %24, %25 : vector<8x128xf32>
    %27 = arith.truncf %26 : vector<8x128xf32> to vector<8x128xbf16>
    %c0_19 = arith.constant 0 : index
    %c0_20 = arith.constant 0 : index
    %28 = vector.load %arg6[%c0_19, %c0_20] : memref<128x128xbf16, #tpu.memory_space<vmem>>, vector<128x128xbf16>
    %cst_21 = arith.constant dense<0.000000e+00> : vector<8x128xf32>
    %29 = tpu.matmul %27, %28, %cst_21 {dimension_numbers = #tpu.dot_dimension_numbers<[1], [0], [0], [1], [0, 0, 1, 1], [], []>} : vector<8x128xbf16>, vector<128x128xbf16>, vector<8x128xf32> -> vector<8x128xf32>
    %c0_22 = arith.constant 0 : index
    %c0_23 = arith.constant 0 : index
    %30 = vector.load %arg7[%c0_22, %c0_23] : memref<1x128xf32, #tpu.memory_space<vmem>>, vector<1x128xf32>
    %31 = vector.broadcast %30 : vector<1x128xf32> to vector<8x128xf32>
    %32 = arith.addf %29, %31 : vector<8x128xf32>
    %cst_24 = arith.constant dense<0xFF800000> : vector<8xf32>
    %33 = vector.multi_reduction <maximumf>, %32, %cst_24 [1] : vector<8x128xf32> to vector<8xf32>
    %34 = vector.shape_cast %33 : vector<8xf32> to vector<8x1xf32>
    %35 = vector.broadcast %34 : vector<8x1xf32> to vector<8x128xf32>
    %36 = arith.subf %32, %35 : vector<8x128xf32>
    %37 = math.exp %36 : vector<8x128xf32>
    %cst_25 = arith.constant dense<0.000000e+00> : vector<8xf32>
    %38 = vector.multi_reduction <add>, %37, %cst_25 [1] : vector<8x128xf32> to vector<8xf32>
    %39 = vector.shape_cast %38 : vector<8xf32> to vector<8x1xf32>
    %40 = math.log %39 : vector<8x1xf32>
    %41 = vector.broadcast %40 : vector<8x1xf32> to vector<8x128xf32>
    %42 = arith.subf %36, %41 : vector<8x128xf32>
    %c0_26 = arith.constant 0 : index
    %c0_27 = arith.constant 0 : index
    %43 = vector.load %arg8[%c0_26, %c0_27] : memref<8x128xf32, #tpu.memory_space<vmem>>, vector<8x128xf32>
    tpu.vector_store %arg8[%c0_26, %c0_27], %42 {strides = array<i32>} : memref<8x128xf32, #tpu.memory_space<vmem>>, vector<8x128xf32>,
    return
  }
  func.func @transform_0(%arg0: i32) -> (i32, i32) {
    %c0_i32 = arith.constant 0 : i32
    %c0_i32_0 = arith.constant 0 : i32
    return %arg0, %c0_i32 : i32, i32
  }
  func.func @transform_1(%arg0: i32) -> (i32, i32) {
    %c0_i32 = arith.constant 0 : i32
    %c0_i32_0 = arith.constant 0 : i32
    %c0_i32_1 = arith.constant 0 : i32
    return %c0_i32, %c0_i32_0 : i32, i32
  }
  func.func @transform_2(%arg0: i32) -> (i32, i32) {
    %c0_i32 = arith.constant 0 : i32
    %c0_i32_0 = arith.constant 0 : i32
    %c0_i32_1 = arith.constant 0 : i32
    return %c0_i32, %c0_i32_0 : i32, i32
  }
  func.func @transform_3(%arg0: i32) -> (i32, i32, i32) {
    %c0_i32 = arith.constant 0 : i32
    %c0_i32_0 = arith.constant 0 : i32
    %c0_i32_1 = arith.constant 0 : i32
    %c0_i32_2 = arith.constant 0 : i32
    return %c0_i32, %c0_i32_0, %c0_i32_1 : i32, i32, i32
  }
  func.func @transform_4(%arg0: i32) -> (i32, i32) {
    %c0_i32 = arith.constant 0 : i32
    %c0_i32_0 = arith.constant 0 : i32
    %c0_i32_1 = arith.constant 0 : i32
    return %c0_i32, %c0_i32_0 : i32, i32
  }
  func.func @transform_5(%arg0: i32) -> (i32, i32) {
    %c0_i32 = arith.constant 0 : i32
    %c0_i32_0 = arith.constant 0 : i32
    %c0_i32_1 = arith.constant 0 : i32
    return %c0_i32, %c0_i32_0 : i32, i32
  }
  func.func @transform_6(%arg0: i32) -> (i32, i32) {
    %c0_i32 = arith.constant 0 : i32
    %c0_i32_0 = arith.constant 0 : i32
    %c0_i32_1 = arith.constant 0 : i32
    return %c0_i32, %c0_i32_0 : i32, i32
  }
  func.func @transform_7(%arg0: i32) -> (i32, i32) {
    %c0_i32 = arith.constant 0 : i32
    %c0_i32_0 = arith.constant 0 : i32
    return %arg0, %c0_i32 : i32, i32
  }
}

</mosaic_0001>

<bundles_post_ra>
// kernel: net_forward.1
= control target key start
LH: loop header
LB: loop body
LE: loop exit
PB: predicated region body
PF: predicated region fallthrough
CT: control target
= control target key end

     0   :  { %12 = vsyncpa [#allocation3], 0  ;;  %s1490_s24 = smov [#allocation2]   ;;  %s1679_s0 = inlined_call_operand.vmem [shape: f32[8,1024], index: 0, kind: input, shape index: {}]   ;;  %s1680_s1 = inlined_call_operand.hbm [shape: bf16[1024,128], index: 1, kind: input, shape index: {}]   ;;  %s1681_s2 = inlined_call_operand.vmem [shape: f32[1,128], index: 2, kind: input, shape index: {}]   ;;  %s1682_s3 = inlined_call_operand.vmem [shape: bf16[2,128,128], index: 3, kind: input, shape index: {}]   ;;  %s1683_s4 = inlined_call_operand.vmem [shape: f32[2,128], index: 4, kind: input, shape index: {}]   ;;  %s1684_s5 = inlined_call_operand.vmem [shape: bf16[128,128], index: 5, kind: input, shape index: {}]   ;;  %s1685_s6 = inlined_call_operand.vmem [shape: f32[1,128], index: 6, kind: input, shape index: {}]   ;;  %s1686_s7 = inlined_call_operand.vmem [shape: f32[8,128], index: 7, kind: output, shape index: {}]  }
   0x1   :  { %s20_s25 = sshll.u32 %s1490_s24, 4  ;;  %s21_s25 = int_to_ptr.vmem [resolvable:$true] %s20_s25 }
   0x2   :  { %s1476_s26 = scalar_lea.vmem %s21_s25, 8192  ;;  %p1481_p1 = scmp.lt.s32.totalorder %s21_s25, %s21_s25 }
   0x3   :  { %p1477_p0 = scmp.ne.s32.totalorder %s21_s25, %s1476_s26  ;;  %p1482_p2 = scmp.lt.s32.totalorder %s1476_s26, %s1476_s26 }
   0x5   :  { %p1483_p3 = por %p1482_p2, %p1481_p1 }
   0x7   :  { %p1484_p4 = pnand %p1483_p3, %p1477_p0 }
   0x9   :  { %1487 = shalt.err (!%p1484_p4)
}
   0xa   :  { %s1491_s27 = smov 64   ;;  %s1492_s28 = smov 4  }
   0xb   :  { %26 = dma.hbm_to_vmem [thread:$0]  %s1680_s1, 8192, %s21_s25, [#allocation3], %s1491_s27, %s1491_s27, %s1492_s28  }
   0xc   :  { %1488 = dma.done.wait [#allocation3], 8192  }
   0xd   :  { %1489 = vsyncadd [#allocation3], 4294959104  ;;  %v1376_v0 = vld [vmem:[#allocation2 + $0x78] sm:$0xff]   ;;  %v1380_v4 = vld [vmem:[#allocation2 + $0x70] sm:$0xff]   ;;  %vm1494_vm0 = vmmov 0  }
   0xe   :  { %v1377_v1 = vld [vmem:[#allocation2 + $0xf8] sm:$0xff]   ;;  %1196 = vmatprep.subr.bf16.mxu0 %v1376_v0  ;;  %v1381_v5 = vld [vmem:[#allocation2 + $0xf0] sm:$0xff]   ;;  %v1384_v8 = vld [vmem:[#allocation2 + $0x68] sm:$0xff]  }
   0xf   :  { %v1378_v2 = vld [vmem:[#allocation2 + $0x38] sm:$0xff]   ;;  %1218 = vmatprep.subr.bf16.mxu1 %v1377_v1  ;;  %v1382_v6 = vld [vmem:[#allocation2 + $0x30] sm:$0xff]   ;;  %v1385_v9 = vld [vmem:[#allocation2 + $0xe8] sm:$0xff]  }
  0x10   :  { %v1379_v3 = vld [vmem:[#allocation2 + $0xb8] sm:$0xff]   ;;  %1197 = vmatpush3.bf16.msra.mxu0 %v1378_v2  ;;  %v1383_v7 = vld [vmem:[#allocation2 + $0xb0] sm:$0xff]   ;;  %v1386_v10 = vld [vmem:[#allocation2 + $0x28] sm:$0xff]  }
  0x11   :  { %1219 = vmatpush3.bf16.msra.mxu1 %v1379_v3  ;;  %1198 = vmatprep.subr.bf16.mxu0 %v1380_v4  ;;  %v1387_v11 = vld [vmem:[#allocation2 + $0xa8] sm:$0xff]   ;;  %v1388_v12 = vld [vmem:[#allocation2 + $0x60] sm:$0xff]   ;;  %v1392_v16 = vld [vmem:[#allocation2 + $0x58] sm:$0xff]  }
  0x12   :  { %1220 = vmatprep.subr.bf16.mxu1 %v1381_v5  ;;  %v1389_v13 = vld [vmem:[#allocation2 + $0xe0] sm:$0xff]   ;;  %v1393_v17 = vld [vmem:[#allocation2 + $0xd8] sm:$0xff]   ;;  %v1396_v20 = vld [vmem:[#allocation2 + $0x50] sm:$0xff]  }
  0x13   :  { %v1390_v14 = vld [vmem:[#allocation2 + $0x20] sm:$0xff]   ;;  %v1394_v18 = vld [vmem:[#allocation2 + $0x18] sm:$0xff]   ;;  %v1397_v21 = vld [vmem:[#allocation2 + $0xd0] sm:$0xff]  }
  0x14   :  { %1199 = vmatpush3.bf16.msra.mxu0 %v1382_v6  ;;  %v1391_v15 = vld [vmem:[#allocation2 + $0xa0] sm:$0xff]   ;;  %v1395_v19 = vld [vmem:[#allocation2 + $0x98] sm:$0xff]   ;;  %v1398_v22 = vld [vmem:[#allocation2 + $0x10] sm:$0xff]  }
  0x15   :  { %1221 = vmatpush3.bf16.msra.mxu1 %v1383_v7  ;;  %1200 = vmatprep.subr.bf16.mxu0 %v1384_v8  ;;  %v1399_v23 = vld [vmem:[#allocation2 + $0x90] sm:$0xff]   ;;  %v1400_v24 = vld [vmem:[#allocation2 + $0x48] sm:$0xff]   ;;  %v1404_v28 = vld [vmem:[#allocation2 + $0x40] sm:$0xff]  }
  0x16   :  { %1222 = vmatprep.subr.bf16.mxu1 %v1385_v9  ;;  %v1401_v25 = vld [vmem:[#allocation2 + $0xc8] sm:$0xff]   ;;  %v1405_v29 = vld [vmem:[#allocation2 + $0xc0] sm:$0xff]   ;;  %v44_v33 = vld [vmem:[%s1679_s0 + $0x18] sm:$0xff] }
  0x17   :  { %v1402_v26 = vld [vmem:[#allocation2 + $0x8] sm:$0xff]   ;;  %v1406_v30 = vld [vmem:[#allocation2] sm:$0xff]   ;;  %v52_v36 = vpack.c.bf16 %v44_v33, %v44_v33  ;;  %v43_v38 = vld [vmem:[%s1679_s0 + $0x10] sm:$0xff] }
  0x18   :  { %1201 = vmatpush3.bf16.msra.mxu0 %v1386_v10  ;;  %v1403_v27 = vld [vmem:[#allocation2 + $0x88] sm:$0xff]   ;;  %v1407_v31 = vld [vmem:[#allocation2 + $0x80] sm:$0xff]   ;;  %v51_v39 = vpack.c.bf16 %v43_v38, %v43_v38  ;;  %v1408_v40 = vld [vmem:[#allocation2 + $0x178] sm:$0xff]  }
  0x19   :  { %1223 = vmatpush3.bf16.msra.mxu1 %v1387_v11  ;;  %1202 = vmatprep.subr.bf16.mxu0 %v1388_v12  ;;  %v42_v32 = vld [vmem:[%s1679_s0 + $0x8] sm:$0xff]  ;;  %v41_v34 = vld [vmem:[%s1679_s0] sm:$0xff]  ;;  %v1409_v41 = vld [vmem:[#allocation2 + $0x1f8] sm:$0xff]  }
  0x1a   :  { %1224 = vmatprep.subr.bf16.mxu1 %v1389_v13  ;;  %v50_v35 = vpack.c.bf16 %v42_v32, %v42_v32  ;;  %v49_v37 = vpack.c.bf16 %v41_v34, %v41_v34  ;;  %648 = vmatprep.mubr.bf16.mxu1 %v52_v36  ;;  %v1410_v42 = vld [vmem:[#allocation2 + $0x138] sm:$0xff]   ;;  %v1412_v44 = vld [vmem:[#allocation2 + $0x170] sm:$0xff]   ;;  %v1416_v48 = vld [vmem:[#allocation2 + $0x168] sm:$0xff]  }
  0x1b   :  { %v1411_v43 = vld [vmem:[#allocation2 + $0x1b8] sm:$0xff]   ;;  %v1413_v45 = vld [vmem:[#allocation2 + $0x1f0] sm:$0xff]   ;;  %v1417_v49 = vld [vmem:[#allocation2 + $0x1e8] sm:$0xff]  }
  0x1c   :  { %1203 = vmatpush3.bf16.msra.mxu0 %v1390_v14  ;;  %608 = vmatprep.mubr.bf16.mxu0 %v50_v35  ;;  %v1414_v46 = vld [vmem:[#allocation2 + $0x130] sm:$0xff]   ;;  %v1418_v50 = vld [vmem:[#allocation2 + $0x128] sm:$0xff]   ;;  %v1420_v52 = vld [vmem:[#allocation2 + $0x160] sm:$0xff]  }
  0x1d   :  { %1225 = vmatpush3.bf16.msra.mxu1 %v1391_v15  ;;  %1204 = vmatprep.subr.bf16.mxu0 %v1392_v16  ;;  %v1415_v47 = vld [vmem:[#allocation2 + $0x1b0] sm:$0xff]   ;;  %v1419_v51 = vld [vmem:[#allocation2 + $0x1a8] sm:$0xff]   ;;  %v1421_v53 = vld [vmem:[#allocation2 + $0x1e0] sm:$0xff]  }
  0x1e   :  { %1226 = vmatprep.subr.bf16.mxu1 %v1393_v17  ;;  %v1422_v54 = vld [vmem:[#allocation2 + $0x120] sm:$0xff]   ;;  %v1424_v56 = vld [vmem:[#allocation2 + $0x158] sm:$0xff]   ;;  %v1428_v60 = vld [vmem:[#allocation2 + $0x150] sm:$0xff]   ;;  %v1493_v17 = vmov 0.0  }
  0x1f   :  { %v1423_v55 = vld [vmem:[#allocation2 + $0x1a0] sm:$0xff]   ;;  %v1425_v57 = vld [vmem:[#allocation2 + $0x1d8] sm:$0xff]   ;;  %v1429_v61 = vld [vmem:[#allocation2 + $0x1d0] sm:$0xff]  }
  0x20   :  { %1205 = vmatpush3.bf16.msra.mxu0 %v1394_v18  ;;  %v1426_v58 = vld [vmem:[#allocation2 + $0x118] sm:$0xff]   ;;  %v1430_v62 = vld [vmem:[#allocation2 + $0x110] sm:$0xff]   ;;  %v1432_v0 = vld [vmem:[#allocation2 + $0x148] sm:$0xff]  }
  0x21   :  { %1227 = vmatpush3.bf16.msra.mxu1 %v1395_v19  ;;  %1206 = vmatprep.subr.bf16.mxu0 %v1396_v20  ;;  %v1427_v59 = vld [vmem:[#allocation2 + $0x198] sm:$0xff]   ;;  %v1431_v63 = vld [vmem:[#allocation2 + $0x190] sm:$0xff]   ;;  %v1433_v1 = vld [vmem:[#allocation2 + $0x1c8] sm:$0xff]  }
  0x22   :  { %1228 = vmatprep.subr.bf16.mxu1 %v1397_v21  ;;  %v1434_v2 = vld [vmem:[#allocation2 + $0x108] sm:$0xff]   ;;  %v1436_v4 = vld [vmem:[#allocation2 + $0x140] sm:$0xff]   ;;  %v48_v9 = vld [vmem:[%s1679_s0 + $0x38] sm:$0xff] }
  0x23   :  { %v1435_v3 = vld [vmem:[#allocation2 + $0x188] sm:$0xff]   ;;  %v1437_v5 = vld [vmem:[#allocation2 + $0x1c0] sm:$0xff]   ;;  %v56_v11 = vpack.c.bf16 %v48_v9, %v48_v9  ;;  %v47_v13 = vld [vmem:[%s1679_s0 + $0x30] sm:$0xff] }
  0x24   :  { %1207 = vmatpush3.bf16.msra.mxu0 %v1398_v22  ;;  %v1438_v6 = vld [vmem:[#allocation2 + $0x100] sm:$0xff]   ;;  %v46_v8 = vld [vmem:[%s1679_s0 + $0x28] sm:$0xff]  ;;  %v55_v15 = vpack.c.bf16 %v47_v13, %v47_v13  ;;  %v1440_v16 = vld [vmem:[%s1682_s3 + $0x38] sm:$0xff]  }
  0x25   :  { %1229 = vmatpush3.bf16.msra.mxu1 %v1399_v23  ;;  %1208 = vmatprep.subr.bf16.mxu0 %v1400_v24  ;;  %v1439_v7 = vld [vmem:[#allocation2 + $0x180] sm:$0xff]   ;;  %v54_v10 = vpack.c.bf16 %v46_v8, %v46_v8  ;;  %v1441_v18 = vld [vmem:[%s1682_s3 + $0x30] sm:$0xff]   ;;  %v1442_v19 = vld [vmem:[%s1682_s3 + $0x28] sm:$0xff]  }
  0x26   :  { %1230 = vmatprep.subr.bf16.mxu1 %v1401_v25  ;;  %v45_v12 = vld [vmem:[%s1679_s0 + $0x20] sm:$0xff]  ;;  %v1444_v21 = vld [vmem:[%s1682_s3 + $0x18] sm:$0xff]   ;;  %v1445_v22 = vld [vmem:[%s1682_s3 + $0x10] sm:$0xff]  }
  0x27   :  { %v53_v14 = vpack.c.bf16 %v45_v12, %v45_v12  ;;  %v1443_v20 = vld [vmem:[%s1682_s3 + $0x20] sm:$0xff]   ;;  %v1446_v23 = vld [vmem:[%s1682_s3 + $0x8] sm:$0xff]   ;;  %v1448_v25 = vld [vmem:[%s1682_s3 + $0x78] sm:$0xff]  }
  0x28   :  { %1209 = vmatpush3.bf16.msra.mxu0 %v1402_v26  ;;  %v1447_v24 = vld [vmem:[%s1682_s3] sm:$0xff]   ;;  %v1449_v26 = vld [vmem:[%s1682_s3 + $0x70] sm:$0xff]  }
  0x29   :  { %1231 = vmatpush3.bf16.msra.mxu1 %v1403_v27  ;;  %1210 = vmatprep.subr.bf16.mxu0 %v1404_v28  ;;  %v1450_v27 = vld [vmem:[%s1682_s3 + $0x68] sm:$0xff]   ;;  %v1451_v28 = vld [vmem:[%s1682_s3 + $0x60] sm:$0xff]  }
  0x2a   :  { %1232 = vmatprep.subr.bf16.mxu1 %v1405_v29  ;;  %v1452_v29 = vld [vmem:[%s1682_s3 + $0x58] sm:$0xff]   ;;  %v1178_v12 = vld [vmem:[%s1683_s4 + $0x1] ss:$0 sm:$0xff] }
  0x2c   :  { %1211 = vmatpush3.bf16.msra.mxu0 %v1406_v30  ;;  %v1453_v30 = vld [vmem:[%s1682_s3 + $0x50] sm:$0xff]  }
  0x2d   :  { %1233 = vmatpush3.bf16.msra.mxu1 %v1407_v31  ;;  %1240 = vmatprep.subr.bf16.mxu0 %v1408_v40  ;;  %v1088_v40 = vld [vmem:[%s1681_s2] ss:$0 sm:$0xff] }
  0x2e   :  { %1262 = vmatprep.subr.bf16.mxu1 %v1409_v41 }
  0x2f   :  { %609 = vmatmul.mubr.bf16.vlgmr.msra.gmra.mxu0 %v49_v37 }
  0x30   :  { %649 = vmatmul.mubr.bf16.vlgmr.msra.gmra.mxu1 %v51_v39  ;;  %1241 = vmatpush3.bf16.msra.mxu0 %v1410_v42 }
  0x31   :  { %1263 = vmatpush3.bf16.msra.mxu1 %v1411_v43  ;;  %1242 = vmatprep.subr.bf16.mxu0 %v1412_v44 }
  0x32   :  { %1264 = vmatprep.subr.bf16.mxu1 %v1413_v45  ;;  %688 = vmatprep.mubr.bf16.mxu0 %v54_v10  ;;  %v1462_v10 = vld [vmem:[%s1684_s5 + $0x8] sm:$0xff]  }
  0x33   :  { %728 = vmatprep.mubr.bf16.mxu1 %v56_v11  ;;  %v1463_v11 = vld [vmem:[%s1684_s5] sm:$0xff]  }
  0x34   :  { %1243 = vmatpush3.bf16.msra.mxu0 %v1414_v46 }
  0x35   :  { %1265 = vmatpush3.bf16.msra.mxu1 %v1415_v47  ;;  %1244 = vmatprep.subr.bf16.mxu0 %v1416_v48 }
  0x36   :  { %1266 = vmatprep.subr.bf16.mxu1 %v1417_v49 }
  0x38   :  { %1245 = vmatpush3.bf16.msra.mxu0 %v1418_v50 }
  0x39   :  { %1267 = vmatpush3.bf16.msra.mxu1 %v1419_v51  ;;  %1246 = vmatprep.subr.bf16.mxu0 %v1420_v52 }
  0x3a   :  { %1268 = vmatprep.subr.bf16.mxu1 %v1421_v53 }
  0x3c   :  { %1247 = vmatpush3.bf16.msra.mxu0 %v1422_v54 }
  0x3d   :  { %1269 = vmatpush3.bf16.msra.mxu1 %v1423_v55  ;;  %1248 = vmatprep.subr.bf16.mxu0 %v1424_v56 }
  0x3e   :  { %1270 = vmatprep.subr.bf16.mxu1 %v1425_v57 }
  0x40   :  { %1249 = vmatpush3.bf16.msra.mxu0 %v1426_v58  ;;  %v1454_v58 = vld [vmem:[%s1682_s3 + $0x48] sm:$0xff]  }
  0x41   :  { %1271 = vmatpush3.bf16.msra.mxu1 %v1427_v59  ;;  %1250 = vmatprep.subr.bf16.mxu0 %v1428_v60  ;;  %v1455_v59 = vld [vmem:[%s1682_s3 + $0x40] sm:$0xff]   ;;  %v1456_v60 = vld [vmem:[%s1684_s5 + $0x38] sm:$0xff]  }
  0x42   :  { %1272 = vmatprep.subr.bf16.mxu1 %v1429_v61  ;;  %v1457_v61 = vld [vmem:[%s1684_s5 + $0x30] sm:$0xff]  }
  0x44   :  { %1251 = vmatpush3.bf16.msra.mxu0 %v1430_v62  ;;  %v1458_v62 = vld [vmem:[%s1684_s5 + $0x28] sm:$0xff]  }
  0x45   :  { %1273 = vmatpush3.bf16.msra.mxu1 %v1431_v63  ;;  %1252 = vmatprep.subr.bf16.mxu0 %v1432_v0  ;;  %v1459_v63 = vld [vmem:[%s1684_s5 + $0x20] sm:$0xff]   ;;  %v1460_v0 = vld [vmem:[%s1684_s5 + $0x18] sm:$0xff]  }
  0x46   :  { %1274 = vmatprep.subr.bf16.mxu1 %v1433_v1  ;;  %v1461_v1 = vld [vmem:[%s1684_s5 + $0x10] sm:$0xff]  }
  0x48   :  { %1253 = vmatpush3.bf16.msra.mxu0 %v1434_v2  ;;  %v1153_v2 = vld [vmem:[%s1683_s4] ss:$0 sm:$0xff] }
  0x49   :  { %1275 = vmatpush3.bf16.msra.mxu1 %v1435_v3  ;;  %1254 = vmatprep.subr.bf16.mxu0 %v1436_v4 }
  0x4a   :  { %1276 = vmatprep.subr.bf16.mxu1 %v1437_v5 }
  0x4c   :  { %1255 = vmatpush3.bf16.msra.mxu0 %v1438_v6 }
  0x4d   :  { %1277 = vmatpush3.bf16.msra.mxu1 %v1439_v7  ;;  %1311 = vmatprep.subr.bf16.mxu0 %v1493_v17 }
  0x4e   :  { %1331 = vmatprep.subr.bf16.mxu1 %v1493_v17 }
  0x4f   :  { %689 = vmatmul.mubr.bf16.vlgmr.msra.gmra.mxu0 %v53_v14 }
  0x50   :  { %729 = vmatmul.mubr.bf16.vlgmr.msra.gmra.mxu1 %v55_v15  ;;  %1312 = vmatpush3.bf16.msra.mxu0 %v1440_v16 }
  0x51   :  { %1313 = vmatprep.subr.bf16.mxu0 %v1493_v17  ;;  %1327 = vmatprep.mubr.msk.bf16.mxu0 %vm1494_vm0, %v1493_v17 }
  0x52   :  { %1347 = vmatprep.mubr.msk.bf16.mxu1 %vm1494_vm0, %v1493_v17  ;;  %1332 = vmatpush3.bf16.msra.mxu1 %v1448_v25 }
  0x53   :  { %1333 = vmatprep.subr.bf16.mxu1 %v1493_v17 }
  0x54   :  { %1314 = vmatpush3.bf16.msra.mxu0 %v1441_v18 }
  0x55   :  { %1315 = vmatprep.subr.bf16.mxu0 %v1493_v17 }
  0x56   :  { %1334 = vmatpush3.bf16.msra.mxu1 %v1449_v26 }
  0x57   :  { %1335 = vmatprep.subr.bf16.mxu1 %v1493_v17 }
  0x58   :  { %1316 = vmatpush3.bf16.msra.mxu0 %v1442_v19 }
  0x59   :  { %1317 = vmatprep.subr.bf16.mxu0 %v1493_v17 }
  0x5a   :  { %1336 = vmatpush3.bf16.msra.mxu1 %v1450_v27 }
  0x5b   :  { %1337 = vmatprep.subr.bf16.mxu1 %v1493_v17 }
  0x5c   :  { %1318 = vmatpush3.bf16.msra.mxu0 %v1443_v20 }
  0x5d   :  { %1319 = vmatprep.subr.bf16.mxu0 %v1493_v17 }
  0x5e   :  { %1338 = vmatpush3.bf16.msra.mxu1 %v1451_v28 }
  0x5f   :  { %1339 = vmatprep.subr.bf16.mxu1 %v1493_v17 }
  0x60   :  { %1320 = vmatpush3.bf16.msra.mxu0 %v1444_v21 }
  0x61   :  { %1321 = vmatprep.subr.bf16.mxu0 %v1493_v17 }
  0x62   :  { %1340 = vmatpush3.bf16.msra.mxu1 %v1452_v29 }
  0x63   :  { %1341 = vmatprep.subr.bf16.mxu1 %v1493_v17 }
  0x64   :  { %1322 = vmatpush3.bf16.msra.mxu0 %v1445_v22 }
  0x65   :  { %1323 = vmatprep.subr.bf16.mxu0 %v1493_v17 }
  0x66   :  { %1342 = vmatpush3.bf16.msra.mxu1 %v1453_v30 }
  0x67   :  { %1343 = vmatprep.subr.bf16.mxu1 %v1493_v17 }
  0x68   :  { %1324 = vmatpush3.bf16.msra.mxu0 %v1446_v23 }
  0x69   :  { %1325 = vmatprep.subr.bf16.mxu0 %v1493_v17 }
  0x6a   :  { %1344 = vmatpush3.bf16.msra.mxu1 %v1454_v58 }
  0x6b   :  { %1345 = vmatprep.subr.bf16.mxu1 %v1493_v17 }
  0x6c   :  { %1326 = vmatpush3.bf16.msra.mxu0 %v1447_v24 }
  0x6d   :  { %1351 = vmatprep.subr.bf16.mxu0 %v1493_v17 }
  0x6e   :  { %1346 = vmatpush3.bf16.msra.mxu1 %v1455_v59 }
  0xef   :  { %v1212_v31 = vpop.f32.mrf.mxu0 }
  0xf0   :  { %v1234_v32 = vpop.f32.mrf.mxu1 }
  0xf1   :  { %v1213_v33 = vpop.f32.mrf.mxu0 }
  0xf2   :  { %v1235_v34 = vpop.f32.mrf.mxu1  ;;  %v1214_v39 = vadd.f32 %v1213_v33, %v1212_v31 }
  0xf3   :  { %v1215_v35 = vpop.f32.mrf.mxu0  ;;  %v1236_v42 = vadd.f32 %v1235_v34, %v1234_v32 }
  0xf4   :  { %v1237_v36 = vpop.f32.mrf.mxu1  ;;  %v611_v41 = vadd.f32 %v1214_v39, %v1088_v40 }
  0xf5   :  { %v1216_v37 = vpop.f32.mrf.mxu0 }
  0xf6   :  { %v1238_v38 = vpop.f32.mrf.mxu1  ;;  %v651_v46 = vadd.f32 %v1236_v42, %v611_v41 }
 0x10f   :  { %v1256_v43 = vpop.f32.mrf.mxu0 }
 0x110   :  { %v1278_v44 = vpop.f32.mrf.mxu1 }
 0x111   :  { %v1257_v45 = vpop.f32.mrf.mxu0 }
 0x112   :  { %v1258_v47 = vadd.f32 %v1257_v45, %v1256_v43  ;;  %v1279_v48 = vpop.f32.mrf.mxu1 }
 0x113   :  { %v1259_v49 = vpop.f32.mrf.mxu0  ;;  %v1280_v51 = vadd.f32 %v1279_v48, %v1278_v44 }
 0x114   :  { %v691_v50 = vadd.f32 %v1258_v47, %v651_v46  ;;  %v1281_v52 = vpop.f32.mrf.mxu1 }
 0x115   :  { %v1260_v53 = vpop.f32.mrf.mxu0 }
 0x116   :  { %v731_v54 = vadd.f32 %v1280_v51, %v691_v50  ;;  %v1282_v55 = vpop.f32.mrf.mxu1 }
 0x118   :  { %v736_v56 = vmax.f32 %v731_v54, 0.0 }
 0x11a   :  { %v737_v57 = vpack.c.bf16 %v736_v56, %v736_v56 }
 0x11c   :  { %1328 = vmatmul.mubr.bf16.vlgmr.msra.gmra.mxu0 %v737_v57 }
 0x11d   :  { %1367 = vmatprep.mubr.msk.bf16.mxu0 %vm1494_vm0, %v1493_v17  ;;  %1352 = vmatpush3.bf16.msra.mxu0 %v1456_v60 }
 0x11e   :  { %1353 = vmatprep.subr.bf16.mxu0 %v1493_v17 }
 0x121   :  { %1354 = vmatpush3.bf16.msra.mxu0 %v1457_v61 }
 0x122   :  { %1355 = vmatprep.subr.bf16.mxu0 %v1493_v17 }
 0x125   :  { %1356 = vmatpush3.bf16.msra.mxu0 %v1458_v62 }
 0x126   :  { %1357 = vmatprep.subr.bf16.mxu0 %v1493_v17 }
 0x129   :  { %1358 = vmatpush3.bf16.msra.mxu0 %v1459_v63 }
 0x12a   :  { %1359 = vmatprep.subr.bf16.mxu0 %v1493_v17 }
 0x12d   :  { %1360 = vmatpush3.bf16.msra.mxu0 %v1460_v0 }
 0x12e   :  { %1361 = vmatprep.subr.bf16.mxu0 %v1493_v17 }
 0x131   :  { %1362 = vmatpush3.bf16.msra.mxu0 %v1461_v1 }
 0x132   :  { %1363 = vmatprep.subr.bf16.mxu0 %v1493_v17 }
 0x135   :  { %1364 = vmatpush3.bf16.msra.mxu0 %v1462_v10 }
 0x136   :  { %1365 = vmatprep.subr.bf16.mxu0 %v1493_v17  ;;  %v1187_v17 = vld [vmem:[%s1685_s6] ss:$0 sm:$0xff] }
 0x139   :  { %1366 = vmatpush3.bf16.msra.mxu0 %v1463_v11 }
 0x1dc   :  { %v841_v3 = vpop.f32.mrf.mxu0 }
 0x1dd   :  { %v842_v4 = vadd.f32 %v1153_v2, %v841_v3 }
 0x1de   :  { %v1329_v5 = vpop.f32.mrf.mxu0 }
 0x1df   :  { %v847_v6 = vmax.f32 %v842_v4, 0.0 }
 0x1e0   :  { %v844_v7 = vpop.f32.mrf.mxu0 }
 0x1e1   :  { %v848_v8 = vpack.c.bf16 %v847_v6, %v847_v6 }
 0x1e2   :  { %v1330_v9 = vpop.f32.mrf.mxu0 }
 0x1e3   :  { %1348 = vmatmul.mubr.bf16.vlgmr.msra.gmra.mxu1 %v848_v8 }
 0x2a3   :  { %v953_v13 = vpop.f32.mrf.mxu1 }
 0x2a4   :  { %v954_v14 = vadd.f32 %v1178_v12, %v953_v13 }
 0x2a5   :  { %v1349_v15 = vpop.f32.mrf.mxu1 }
 0x2a6   :  { %v959_v16 = vmax.f32 %v954_v14, 0.0 }
 0x2a7   :  { %v956_v18 = vpop.f32.mrf.mxu1 }
 0x2a8   :  { %v960_v19 = vpack.c.bf16 %v959_v16, %v959_v16 }
 0x2a9   :  { %v1350_v20 = vpop.f32.mrf.mxu1 }
 0x2aa   :  { %1368 = vmatmul.mubr.bf16.vlgmr.msra.gmra.mxu0 %v960_v19 }
 0x36a   :  { %v1066_v21 = vpop.f32.mrf.mxu0 }
 0x36b   :  { %v1067_v22 = vadd.f32 %v1187_v17, %v1066_v21 }
 0x36c   :  { %v1369_v23 = vpop.f32.mrf.mxu0 }
 0x36d   :  { %1072 = vmax.xlane.f32.xlu0 %v1067_v22 }
 0x36e   :  { %v1069_v24 = vpop.f32.mrf.mxu0 }
 0x370   :  { %v1370_v25 = vpop.f32.mrf.mxu0 }
 0x3f6   :  { %v1073_v26 = vpop.xlane.xlu0 %1072 }
 0x3f7   :  { %v1074_v27 = vsub.f32 %v1067_v22, %v1073_v26 }
 0x3f9   :  { %v1075_v28 = vmul.f32 1.442695, %v1074_v27 }
 0x3fb   :  { %1464 = vpow2.f32 %v1075_v28 }
 0x408   :  { %v1465_v29 = vpop.eup %1464 }
 0x409   :  { %1077 = vadd.xlane.f32.xlu0 %v1465_v29 }
 0x492   :  { %v1078_v30 = vpop.xlane.xlu0 %1077 }
 0x493   :  { %1466 = vlog2.f32 %v1078_v30 }
 0x4a0   :  { %v1467_v31 = vpop.eup %1466 }
 0x4a1   :  { %v1080_v32 = vmul.f32 0.6931472, %v1467_v31 }
 0x4a3   :  { %v1081_v33 = vsub.f32 %v1074_v27, %v1080_v32 }
 0x4a5   :  { %1082 = vst [vmem:[%s1686_s7] sm:$0xff] %v1081_v33 }
 0x4a6   :  { %1087 = vsyncpa [#allocation3], 1 }

</bundles_post_ra>
